<compile_context>
chip_gen: v7x
topology: tpu7x:2x2x1
jax: 0.10.0
libtpu: 0.0.40
codegen_flags: <defaults>
</compile_context>

<pallas_src>
import functools

import jax
import jax.numpy as jnp
from jax.experimental import pallas as pl
from jax.experimental.pallas import tpu as pltpu

LOG_SIG_MAX = 2.0
LOG_SIG_MIN = -20.0

LANE = 128
SUBLANE = 8


def _round_up(x, m):
    return ((x + m - 1) // m) * m


def _policy_kernel(s_ref, w1_ref, b1_ref, w2_ref, b2_ref, wh_ref, bh_ref,
                   mean_ref, logstd_ref, *, action_dim):
    # Layer 1: bf16/f32 MXU operands, f32 accumulate, f32 bias + ReLU on the VPU.
    a = jnp.dot(s_ref[...], w1_ref[...], preferred_element_type=jnp.float32)
    a = jnp.maximum(a + b1_ref[...], 0.0)
    # Layer 2.
    a = jnp.dot(a.astype(w2_ref.dtype), w2_ref[...], preferred_element_type=jnp.float32)
    a = jnp.maximum(a + b2_ref[...], 0.0)
    # Fused heads [mean | log_std]: single matmul of width 2*action_dim; clamp the
    # log_std half in-kernel and store only the real columns (no padded slab).
    h = jnp.dot(a.astype(wh_ref.dtype), wh_ref[...], preferred_element_type=jnp.float32)
    h = h + bh_ref[...]
    mean_ref[...] = h[:, :action_dim].astype(mean_ref.dtype)
    logstd_ref[...] = jnp.clip(h[:, action_dim:],
                               LOG_SIG_MIN, LOG_SIG_MAX).astype(logstd_ref.dtype)


def prepare_params(params, *, use_bf16=True):
    """Fuse the two heads and zero-pad the hidden dim to a lane multiple.

    Done once outside the kernel; zero padding is numerically exact.  Matmul
    operands default to bf16 (native MXU path on all generations); accumulation
    and elementwise math in the kernel stay f32.  Pass use_bf16=False for the
    bit-tight f32 path.
    """
    w1, b1 = params["w1"], params["b1"]
    w2, b2 = params["w2"], params["b2"]
    wm, bm = params["wm"], params["bm"]
    ws, bs = params["ws"], params["bs"]

    state_dim, hidden = w1.shape
    action_dim = wm.shape[1]
    hidden_p = _round_up(hidden, LANE)   # 128-aligned; do NOT over-pad to 256.
    head_dim = 2 * action_dim

    def pad2(x, rows, cols):
        return jnp.pad(x, ((0, rows - x.shape[0]), (0, cols - x.shape[1])))

    mm_dtype = jnp.bfloat16 if use_bf16 else jnp.float32
    wh = jnp.concatenate([wm, ws], axis=1)          # [hidden, 2*action_dim]
    bh = jnp.concatenate([bm, bs], axis=1)          # [1, 2*action_dim]

    packed = dict(
        w1=pad2(w1, state_dim, hidden_p).astype(mm_dtype),
        b1=pad2(b1, 1, hidden_p).astype(jnp.float32),
        w2=pad2(w2, hidden_p, hidden_p).astype(mm_dtype),
        b2=pad2(b2, 1, hidden_p).astype(jnp.float32),
        wh=pad2(wh, hidden_p, head_dim).astype(mm_dtype),
        bh=bh.astype(jnp.float32),
    )
    meta = dict(state_dim=state_dim, action_dim=action_dim,
                hidden_p=hidden_p, mm_dtype=mm_dtype)
    return packed, meta


@functools.partial(jax.jit, static_argnames=("action_dim", "hidden_p", "batch_tile"))
def _forward_impl(state, w1, b1, w2, b2, wh, bh, *, action_dim, hidden_p, batch_tile):
    B, state_dim = state.shape
    head_dim = 2 * action_dim

    # Batch tile: >= 2 grid steps when B > 8 so v7x's two TensorCores split the
    # "parallel" axis; cap rows/step at batch_tile (VMEM is never the binding
    # constraint at these sizes).  No explicit batch pad — Pallas handles the
    # partial edge block, and every op here is per-row.
    num_tiles = max(pl.cdiv(B, batch_tile), 2 if B > SUBLANE else 1)
    tb = _round_up(pl.cdiv(B, num_tiles), SUBLANE)
    grid = (pl.cdiv(B, tb),)

    x = state.astype(w1.dtype)

    w_itemsize = jnp.dtype(w1.dtype).itemsize
    flops = 2 * B * (state_dim * hidden_p + hidden_p * hidden_p + hidden_p * head_dim)
    bytes_accessed = (
        B * state_dim * w_itemsize
        + (state_dim * hidden_p + hidden_p * hidden_p + hidden_p * head_dim) * w_itemsize
        + (2 * hidden_p + head_dim) * 4
        + B * head_dim * 4)

    mean, log_std = pl.pallas_call(
        functools.partial(_policy_kernel, action_dim=action_dim),
        out_shape=(jax.ShapeDtypeStruct((B, action_dim), jnp.float32),
                   jax.ShapeDtypeStruct((B, action_dim), jnp.float32)),
        grid=grid,
        in_specs=[
            pl.BlockSpec((tb, state_dim), lambda i: (i, 0)),         # state: batch-tiled
            pl.BlockSpec((state_dim, hidden_p), lambda i: (0, 0)),   # weights / biases:
            pl.BlockSpec((1, hidden_p), lambda i: (0, 0)),           # constant index_map ->
            pl.BlockSpec((hidden_p, hidden_p), lambda i: (0, 0)),    # VMEM-resident across
            pl.BlockSpec((1, hidden_p), lambda i: (0, 0)),           # grid steps
            pl.BlockSpec((hidden_p, head_dim), lambda i: (0, 0)),
            pl.BlockSpec((1, head_dim), lambda i: (0, 0)),
        ],
        out_specs=(pl.BlockSpec((tb, action_dim), lambda i: (i, 0)),
                   pl.BlockSpec((tb, action_dim), lambda i: (i, 0))),
        compiler_params=pltpu.CompilerParams(
            dimension_semantics=("parallel",)),  # megacore batch split on v7x
        cost_estimate=pl.CostEstimate(flops=flops, transcendentals=0,
                                      bytes_accessed=bytes_accessed),
    )(x, w1, b1, w2, b2, wh, bh)
    return mean, log_std


def gaussian_policy_forward(state, packed, meta, *, batch_tile=1024):
    """state: [B, state_dim] f32. packed/meta: from prepare_params()."""
    return _forward_impl(
        state,
        packed["w1"], packed["b1"], packed["w2"], packed["b2"],
        packed["wh"], packed["bh"],
        action_dim=meta["action_dim"],
        hidden_p=meta["hidden_p"],
        batch_tile=batch_tile,
    )


def init_params(key, state_dim, action_dim, hidden_dim):
    """nn.Linear-style init: U(-1/sqrt(fan_in), 1/sqrt(fan_in)); weights stored [in, out]."""
    ks = jax.random.split(key, 8)

    def lin(kw, kb, fan_in, fan_out):
        bound = 1.0 / jnp.sqrt(jnp.float32(fan_in))
        w = jax.random.uniform(kw, (fan_in, fan_out), jnp.float32, -bound, bound)
        b = jax.random.uniform(kb, (1, fan_out), jnp.float32, -bound, bound)
        return w, b

    w1, b1 = lin(ks[0], ks[1], state_dim, hidden_dim)
    w2, b2 = lin(ks[2], ks[3], hidden_dim, hidden_dim)
    wm, bm = lin(ks[4], ks[5], hidden_dim, action_dim)
    ws, bs = lin(ks[6], ks[7], hidden_dim, action_dim)
    return dict(w1=w1, b1=b1, w2=w2, b2=b2, wm=wm, bm=bm, ws=ws, bs=bs)


def reference_forward(state, p):
    a = jnp.maximum(state @ p["w1"] + p["b1"], 0.0)
    a = jnp.maximum(a @ p["w2"] + p["b2"], 0.0)
    mean = a @ p["wm"] + p["bm"]
    log_std = jnp.clip(a @ p["ws"] + p["bs"], LOG_SIG_MIN, LOG_SIG_MAX)
    return mean, log_std


if __name__ == "__main__":
    # Small shapes consistent with the module's forward.
    key = jax.random.PRNGKey(0)
    k_state, k_params, k_state2 = jax.random.split(key, 3)

    batch, state_dim, action_dim, hidden_dim = 8, 16, 4, 32
    state = jax.random.normal(k_state, (batch, state_dim), jnp.float32)
    params = init_params(k_params, state_dim, action_dim, hidden_dim)
    ref_mean, ref_log_std = reference_forward(state, params)

    # Default fast path: bf16 MXU operands, f32 accumulate / elementwise.
    packed_bf16, meta_bf16 = prepare_params(params, use_bf16=True)
    mean, log_std = gaussian_policy_forward(state, packed_bf16, meta_bf16)
    jax.block_until_ready((mean, log_std))
    assert jnp.allclose(mean, ref_mean, atol=5e-2, rtol=5e-2)
    assert jnp.allclose(log_std, ref_log_std, atol=5e-2, rtol=5e-2)

    # Bit-tight f32 operand path.
    packed_f32, meta_f32 = prepare_params(params, use_bf16=False)
    mean32, log_std32 = gaussian_policy_forward(state, packed_f32, meta_f32)
    jax.block_until_ready((mean32, log_std32))
    assert jnp.allclose(mean32, ref_mean, atol=1e-5, rtol=1e-5)
    assert jnp.allclose(log_std32, ref_log_std, atol=1e-5, rtol=1e-5)

    # Non-multiple-of-8 batch: exercises multi-step grid + partial edge block (no jnp.pad).
    state_e = jax.random.normal(k_state2, (12, state_dim), jnp.float32)
    mean_e, log_std_e = gaussian_policy_forward(state_e, packed_f32, meta_f32)
    jax.block_until_ready((mean_e, log_std_e))
    ref_mean_e, ref_log_std_e = reference_forward(state_e, params)
    assert jnp.allclose(mean_e, ref_mean_e, atol=1e-5, rtol=1e-5)
    assert jnp.allclose(log_std_e, ref_log_std_e, atol=1e-5, rtol=1e-5)

    # TODO(synk): sample() (Normal rsample / tanh squash / log_prob correction) is
    # distribution sampling outside forward() and is intentionally left outside the kernel.

    print("KERNEL_OK")
</pallas_src>

<mosaic_0001>
module attributes {stable_mosaic.version = 11 : i64} {
  func.func @_policy_kernel(%arg0: i32, %arg1: memref<8x16xbf16, #tpu.memory_space<vmem>>, %arg2: memref<16x128xbf16, #tpu.memory_space<vmem>>, %arg3: memref<1x128xf32, #tpu.memory_space<vmem>>, %arg4: memref<128x128xbf16, #tpu.memory_space<vmem>>, %arg5: memref<1x128xf32, #tpu.memory_space<vmem>>, %arg6: memref<128x8xbf16, #tpu.memory_space<vmem>>, %arg7: memref<1x8xf32, #tpu.memory_space<vmem>>, %arg8: memref<8x4xf32, #tpu.memory_space<vmem>>, %arg9: memref<8x4xf32, #tpu.memory_space<vmem>>) attributes {dimension_semantics = [#tpu.dimension_semantics<parallel>], iteration_bounds = array<i64: 1>, scalar_prefetch = 0 : i64, scratch_operands = 0 : i64, tpu.core_type = #tpu.core_type<tc>, window_params = [{transform_indices = @transform_0, window_bounds = array<i64: 8, 16>}, {pipeline_mode = #tpu.pipeline_mode<synchronous>, transform_indices = @transform_1, window_bounds = array<i64: 16, 128>}, {pipeline_mode = #tpu.pipeline_mode<synchronous>, transform_indices = @transform_2, window_bounds = array<i64: 1, 128>}, {pipeline_mode = #tpu.pipeline_mode<synchronous>, transform_indices = @transform_3, window_bounds = array<i64: 128, 128>}, {pipeline_mode = #tpu.pipeline_mode<synchronous>, transform_indices = @transform_4, window_bounds = array<i64: 1, 128>}, {pipeline_mode = #tpu.pipeline_mode<synchronous>, transform_indices = @transform_5, window_bounds = array<i64: 128, 8>}, {pipeline_mode = #tpu.pipeline_mode<synchronous>, transform_indices = @transform_6, window_bounds = array<i64: 1, 8>}, {transform_indices = @transform_7, window_bounds = array<i64: 8, 4>}, {transform_indices = @transform_8, window_bounds = array<i64: 8, 4>}]} {
    %c0 = arith.constant 0 : index
    %c0_0 = arith.constant 0 : index
    %0 = vector.load %arg1[%c0, %c0_0] : memref<8x16xbf16, #tpu.memory_space<vmem>>, vector<8x16xbf16>
    %c0_1 = arith.constant 0 : index
    %c0_2 = arith.constant 0 : index
    %1 = vector.load %arg2[%c0_1, %c0_2] : memref<16x128xbf16, #tpu.memory_space<vmem>>, vector<16x128xbf16>
    %cst = arith.constant dense<0.000000e+00> : vector<8x128xf32>
    %2 = tpu.matmul %0, %1, %cst {dimension_numbers = #tpu.dot_dimension_numbers<[1], [0], [0], [1], [0, 0, 1, 1], [], []>} : vector<8x16xbf16>, vector<16x128xbf16>, vector<8x128xf32> -> vector<8x128xf32>
    %c0_3 = arith.constant 0 : index
    %c0_4 = arith.constant 0 : index
    %3 = vector.load %arg3[%c0_3, %c0_4] : memref<1x128xf32, #tpu.memory_space<vmem>>, vector<1x128xf32>
    %4 = vector.broadcast %3 : vector<1x128xf32> to vector<8x128xf32>
    %5 = arith.addf %2, %4 : vector<8x128xf32>
    %cst_5 = arith.constant 0.000000e+00 : f32
    %6 = vector.broadcast %cst_5 : f32 to vector<8x128xf32>
    %7 = arith.maximumf %5, %6 : vector<8x128xf32>
    %8 = arith.truncf %7 : vector<8x128xf32> to vector<8x128xbf16>
    %c0_6 = arith.constant 0 : index
    %c0_7 = arith.constant 0 : index
    %9 = vector.load %arg4[%c0_6, %c0_7] : memref<128x128xbf16, #tpu.memory_space<vmem>>, vector<128x128xbf16>
    %cst_8 = arith.constant dense<0.000000e+00> : vector<8x128xf32>
    %10 = tpu.matmul %8, %9, %cst_8 {dimension_numbers = #tpu.dot_dimension_numbers<[1], [0], [0], [1], [0, 0, 1, 1], [], []>} : vector<8x128xbf16>, vector<128x128xbf16>, vector<8x128xf32> -> vector<8x128xf32>
    %c0_9 = arith.constant 0 : index
    %c0_10 = arith.constant 0 : index
    %11 = vector.load %arg5[%c0_9, %c0_10] : memref<1x128xf32, #tpu.memory_space<vmem>>, vector<1x128xf32>
    %12 = vector.broadcast %11 : vector<1x128xf32> to vector<8x128xf32>
    %13 = arith.addf %10, %12 : vector<8x128xf32>
    %cst_11 = arith.constant 0.000000e+00 : f32
    %14 = vector.broadcast %cst_11 : f32 to vector<8x128xf32>
    %15 = arith.maximumf %13, %14 : vector<8x128xf32>
    %16 = arith.truncf %15 : vector<8x128xf32> to vector<8x128xbf16>
    %c0_12 = arith.constant 0 : index
    %c0_13 = arith.constant 0 : index
    %17 = vector.load %arg6[%c0_12, %c0_13] : memref<128x8xbf16, #tpu.memory_space<vmem>>, vector<128x8xbf16>
    %cst_14 = arith.constant dense<0.000000e+00> : vector<8x8xf32>
    %18 = tpu.matmul %16, %17, %cst_14 {dimension_numbers = #tpu.dot_dimension_numbers<[1], [0], [0], [1], [0, 0, 1, 1], [], []>} : vector<8x128xbf16>, vector<128x8xbf16>, vector<8x8xf32> -> vector<8x8xf32>
    %c0_15 = arith.constant 0 : index
    %c0_16 = arith.constant 0 : index
    %19 = vector.load %arg7[%c0_15, %c0_16] : memref<1x8xf32, #tpu.memory_space<vmem>>, vector<1x8xf32>
    %20 = vector.broadcast %19 : vector<1x8xf32> to vector<8x8xf32>
    %21 = arith.addf %18, %20 : vector<8x8xf32>
    %22 = vector.extract_strided_slice %21 {offsets = [0, 0], sizes = [8, 4], strides = [1, 1]} : vector<8x8xf32> to vector<8x4xf32>
    %c0_17 = arith.constant 0 : index
    %c0_18 = arith.constant 0 : index
    %23 = vector.load %arg8[%c0_17, %c0_18] : memref<8x4xf32, #tpu.memory_space<vmem>>, vector<8x4xf32>
    tpu.vector_store %arg8[%c0_17, %c0_18], %22 {strides = array<i32>} : memref<8x4xf32, #tpu.memory_space<vmem>>, vector<8x4xf32>,
    %24 = vector.extract_strided_slice %21 {offsets = [0, 4], sizes = [8, 4], strides = [1, 1]} : vector<8x8xf32> to vector<8x4xf32>
    %cst_19 = arith.constant -2.000000e+01 : f32
    %cst_20 = arith.constant 2.000000e+00 : f32
    %25 = vector.broadcast %cst_19 : f32 to vector<8x4xf32>
    %26 = arith.maximumf %25, %24 : vector<8x4xf32>
    %27 = vector.broadcast %cst_20 : f32 to vector<8x4xf32>
    %28 = arith.minimumf %27, %26 : vector<8x4xf32>
    %c0_21 = arith.constant 0 : index
    %c0_22 = arith.constant 0 : index
    %29 = vector.load %arg9[%c0_21, %c0_22] : memref<8x4xf32, #tpu.memory_space<vmem>>, vector<8x4xf32>
    tpu.vector_store %arg9[%c0_21, %c0_22], %28 {strides = array<i32>} : memref<8x4xf32, #tpu.memory_space<vmem>>, vector<8x4xf32>,
    return
  }
  func.func @transform_0(%arg0: i32) -> (i32, i32) {
    %c0_i32 = arith.constant 0 : i32
    %c0_i32_0 = arith.constant 0 : i32
    return %arg0, %c0_i32 : i32, i32
  }
  func.func @transform_1(%arg0: i32) -> (i32, i32) {
    %c0_i32 = arith.constant 0 : i32
    %c0_i32_0 = arith.constant 0 : i32
    %c0_i32_1 = arith.constant 0 : i32
    return %c0_i32, %c0_i32_0 : i32, i32
  }
  func.func @transform_2(%arg0: i32) -> (i32, i32) {
    %c0_i32 = arith.constant 0 : i32
    %c0_i32_0 = arith.constant 0 : i32
    %c0_i32_1 = arith.constant 0 : i32
    return %c0_i32, %c0_i32_0 : i32, i32
  }
  func.func @transform_3(%arg0: i32) -> (i32, i32) {
    %c0_i32 = arith.constant 0 : i32
    %c0_i32_0 = arith.constant 0 : i32
    %c0_i32_1 = arith.constant 0 : i32
    return %c0_i32, %c0_i32_0 : i32, i32
  }
  func.func @transform_4(%arg0: i32) -> (i32, i32) {
    %c0_i32 = arith.constant 0 : i32
    %c0_i32_0 = arith.constant 0 : i32
    %c0_i32_1 = arith.constant 0 : i32
    return %c0_i32, %c0_i32_0 : i32, i32
  }
  func.func @transform_5(%arg0: i32) -> (i32, i32) {
    %c0_i32 = arith.constant 0 : i32
    %c0_i32_0 = arith.constant 0 : i32
    %c0_i32_1 = arith.constant 0 : i32
    return %c0_i32, %c0_i32_0 : i32, i32
  }
  func.func @transform_6(%arg0: i32) -> (i32, i32) {
    %c0_i32 = arith.constant 0 : i32
    %c0_i32_0 = arith.constant 0 : i32
    %c0_i32_1 = arith.constant 0 : i32
    return %c0_i32, %c0_i32_0 : i32, i32
  }
  func.func @transform_7(%arg0: i32) -> (i32, i32) {
    %c0_i32 = arith.constant 0 : i32
    %c0_i32_0 = arith.constant 0 : i32
    return %arg0, %c0_i32 : i32, i32
  }
  func.func @transform_8(%arg0: i32) -> (i32, i32) {
    %c0_i32 = arith.constant 0 : i32
    %c0_i32_0 = arith.constant 0 : i32
    return %arg0, %c0_i32 : i32, i32
  }
}

</mosaic_0001>

<bundles_post_ra>
// kernel: _forward_impl.1
= control target key start
LH: loop header
LB: loop body
LE: loop exit
PB: predicated region body
PF: predicated region fallthrough
CT: control target
= control target key end

     0   :  { %v439_v0 = vmov 0.0   ;;  %vm440_vm0 = vmmov 0   ;;  %vm45_vm1 = vcmask 130048   ;;  %vm315_vm2 = vcmask 31744   ;;  %s441_s19 = smov 124   ;;  %s576_s1 = inlined_call_operand.vmem [shape: bf16[16,128], index: 1, kind: input, shape index: {}]   ;;  %s577_s0 = inlined_call_operand.vmem [shape: bf16[8,16], index: 0, kind: input, shape index: {}]   ;;  %s578_s3 = inlined_call_operand.vmem [shape: bf16[128,128], index: 3, kind: input, shape index: {}]   ;;  %s579_s5 = inlined_call_operand.vmem [shape: bf16[128,8], index: 5, kind: input, shape index: {}]   ;;  %s580_s2 = inlined_call_operand.vmem [shape: f32[1,128], index: 2, kind: input, shape index: {}]   ;;  %s581_s4 = inlined_call_operand.vmem [shape: f32[1,128], index: 4, kind: input, shape index: {}]   ;;  %s582_s6 = inlined_call_operand.vmem [shape: f32[1,8], index: 6, kind: input, shape index: {}]   ;;  %s583_s7 = inlined_call_operand.vmem [shape: f32[8,4], index: 7, kind: output, shape index: {0}]   ;;  %s584_s8 = inlined_call_operand.vmem [shape: f32[8,4], index: 8, kind: output, shape index: {1}]  }
   0x1   :  { %373 = vmatprep.subr.bf16.mxu0 %v439_v0  ;;  %v422_v1 = vld [vmem:[%s576_s1] sm:$0xff]   ;;  %375 = vmatprep.mubr.msk.bf16.mxu0 %vm440_vm0, %v439_v0  ;;  %v424_v4 = vld [vmem:[%s578_s3 + $0x8] sm:$0xff]   ;;  %v425_v5 = vld [vmem:[%s578_s3 + $0x10] sm:$0xff]  }
   0x2   :  { %v29_v2 = vld [vmem:[%s577_s0] sm:$0xf]  ;;  %379 = vmatprep.subr.bf16.mxu1 %v439_v0  ;;  %395 = vmatprep.mubr.msk.bf16.mxu1 %vm440_vm0, %v439_v0  ;;  %v426_v6 = vld [vmem:[%s578_s3 + $0x18] sm:$0xff]   ;;  %v428_v8 = vld [vmem:[%s578_s3 + $0x28] sm:$0xff]  }
   0x3   :  { %374 = vmatpush3.bf16.msra.mxu0 %v422_v1  ;;  %v423_v3 = vld [vmem:[%s578_s3] sm:$0xff]   ;;  %v429_v9 = vld [vmem:[%s578_s3 + $0x30] sm:$0xff]   ;;  %v430_v10 = vld [vmem:[%s578_s3 + $0x38] sm:$0xff]  }
   0x4   :  { %399 = vmatprep.subr.bf16.mxu0 %v439_v0  ;;  %380 = vmatpush3.bf16.msra.mxu1 %v423_v3  ;;  %v427_v7 = vld [vmem:[%s578_s3 + $0x20] sm:$0xff]   ;;  %v432_v12 = vld [vmem:[%s579_s5 + $0x8] sm:$0xff]   ;;  %v433_v13 = vld [vmem:[%s579_s5 + $0x10] sm:$0xff]  }
   0x5   :  { %381 = vmatprep.subr.bf16.mxu1 %v439_v0  ;;  %v431_v11 = vld [vmem:[%s579_s5] sm:$0xff]   ;;  %v434_v14 = vld [vmem:[%s579_s5 + $0x18] sm:$0xff]   ;;  %v436_v16 = vld [vmem:[%s579_s5 + $0x28] sm:$0xff]  }
   0x6   :  { %376 = vmatmul.mubr.msk.bf16.vlgmr.msra.gmra.mrb[0].mxu0 %vm45_vm1, %v29_v2  ;;  %v435_v15 = vld [vmem:[%s579_s5 + $0x20] sm:$0xff]   ;;  %v437_v25 = vld [vmem:[%s579_s5 + $0x30] sm:$0xff]   ;;  %v438_v26 = vld [vmem:[%s579_s5 + $0x38] sm:$0xff]  }
   0x7   :  { %415 = vmatprep.mubr.msk.bf16.mxu0 %vm440_vm0, %v439_v0  ;;  %400 = vmatpush3.bf16.msra.mxu0 %v431_v11  ;;  %v332_v17 = vld [vmem:[%s580_s2] ss:$0 sm:$0xff] }
   0x8   :  { %382 = vmatpush3.bf16.msra.mxu1 %v424_v4  ;;  %401 = vmatprep.subr.bf16.mxu0 %v439_v0  ;;  %v335_v27 = vld [vmem:[%s581_s4] ss:$0 sm:$0xff] }
   0x9   :  { %383 = vmatprep.subr.bf16.mxu1 %v439_v0  ;;  %v344_v35 = vld [vmem:[%s582_s6] ss:$0 sm:$0xff] }
   0xb   :  { %402 = vmatpush3.bf16.msra.mxu0 %v432_v12 }
   0xc   :  { %384 = vmatpush3.bf16.msra.mxu1 %v425_v5  ;;  %403 = vmatprep.subr.bf16.mxu0 %v439_v0 }
   0xd   :  { %385 = vmatprep.subr.bf16.mxu1 %v439_v0 }
   0xf   :  { %404 = vmatpush3.bf16.msra.mxu0 %v433_v13 }
  0x10   :  { %386 = vmatpush3.bf16.msra.mxu1 %v426_v6  ;;  %405 = vmatprep.subr.bf16.mxu0 %v439_v0 }
  0x11   :  { %387 = vmatprep.subr.bf16.mxu1 %v439_v0 }
  0x13   :  { %406 = vmatpush3.bf16.msra.mxu0 %v434_v14 }
  0x14   :  { %388 = vmatpush3.bf16.msra.mxu1 %v427_v7  ;;  %407 = vmatprep.subr.bf16.mxu0 %v439_v0 }
  0x15   :  { %389 = vmatprep.subr.bf16.mxu1 %v439_v0 }
  0x17   :  { %408 = vmatpush3.bf16.msra.mxu0 %v435_v15 }
  0x18   :  { %390 = vmatpush3.bf16.msra.mxu1 %v428_v8  ;;  %409 = vmatprep.subr.bf16.mxu0 %v439_v0 }
  0x19   :  { %391 = vmatprep.subr.bf16.mxu1 %v439_v0 }
  0x1b   :  { %410 = vmatpush3.bf16.msra.mxu0 %v436_v16 }
  0x1c   :  { %392 = vmatpush3.bf16.msra.mxu1 %v429_v9  ;;  %411 = vmatprep.subr.bf16.mxu0 %v439_v0 }
  0x1d   :  { %393 = vmatprep.subr.bf16.mxu1 %v439_v0 }
  0x1f   :  { %412 = vmatpush3.bf16.msra.mxu0 %v437_v25 }
  0x20   :  { %394 = vmatpush3.bf16.msra.mxu1 %v430_v10  ;;  %413 = vmatprep.subr.bf16.mxu0 %v439_v0 }
  0x23   :  { %414 = vmatpush3.bf16.msra.mxu0 %v438_v26 }
  0xd9   :  { %v83_v18 = vpop.f32.mrb[0].mxu0 }
  0xda   :  { %v84_v19 = vadd.f32 %v332_v17, %v83_v18  ;;  %v377_v20 = vpop.f32.mrb[1].mxu0 }
  0xdb   :  { %v86_v21 = vpop.f32.mrb[2].mxu0 }
  0xdc   :  { %v89_v22 = vmax.f32 %v84_v19, 0.0  ;;  %v378_v23 = vpop.f32.mrb[3].mxu0 }
  0xde   :  { %v90_v24 = vpack.c.bf16 %v89_v22, %v89_v22 }
  0xe0   :  { %396 = vmatmul.mubr.bf16.vlgmr.msra.gmra.mrb[0].mxu1 %v90_v24 }
 0x1b3   :  { %v196_v28 = vpop.f32.mrb[0].mxu1 }
 0x1b4   :  { %v197_v29 = vadd.f32 %v335_v27, %v196_v28  ;;  %v397_v30 = vpop.f32.mrb[1].mxu1 }
 0x1b5   :  { %v199_v31 = vpop.f32.mrb[2].mxu1 }
 0x1b6   :  { %v202_v32 = vmax.f32 %v197_v29, 0.0  ;;  %v398_v33 = vpop.f32.mrb[3].mxu1 }
 0x1b8   :  { %v203_v34 = vpack.c.bf16 %v202_v32, %v202_v32 }
 0x1ba   :  { %416 = vmatmul.mubr.bf16.vlgmr.msra.gmra.mrb[4].mxu0 %v203_v34 }
 0x28d   :  { %v309_v36 = vpop.f32.mrb[4].mxu0 }
 0x28e   :  { %v310_v37 = vadd.f32 %v344_v35, %v309_v36  ;;  %v417_v38 = vpop.f32.mrb[5].mxu0 }
 0x28f   :  { %v312_v39 = vpop.f32.mrb[6].mxu0 }
 0x290   :  { %v418_v40 = vpop.f32.mrb[7].mxu0  ;;  %v317_v41 = vmax.f32 %v310_v37, -20.0  ;;  %316 = vst.msk [vmem:[%s583_s7] sm:$0xff] %vm315_vm2, %v310_v37 }
 0x292   :  { %v318_v42 = vmin.f32 %v317_v41, 2.0 }
 0x294   :  { %320 = vrot.lane.b32.xlu0 %v318_v42, %s441_s19 }
 0x306   :  { %v321_v43 = vpop.permute.xlu0 %320 }
 0x307   :  { %323 = vst.msk [vmem:[%s584_s8] sm:$0xff] %vm315_vm2, %v321_v43 }

</bundles_post_ra>
